<compile_context>
chip_gen: v5e
topology: v5e:2x2
jax: 0.10.0
libtpu: 0.0.40
codegen_flags: <defaults>
</compile_context>

<pallas_src>
import functools

import jax
import jax.numpy as jnp
from jax import lax
from jax.experimental import pallas as pl
from jax.experimental.pallas import tpu as pltpu


# ---------------------------------------------------------------------------
# Kernels
# ---------------------------------------------------------------------------

def _resident_attention_kernel(*refs, scale, is_causal, has_bias,
                               output_attention, mm_dtype):
    """grid=(B, H): one (batch, head) per step, resident (L, S) scores."""
    q_ref, k_ref, v_ref = refs[:3]
    idx = 3
    bias_ref = None
    if has_bias:
        bias_ref = refs[idx]
        idx += 1
    o_ref = refs[idx]
    idx += 1
    a_ref = refs[idx] if output_attention else None

    L = q_ref.shape[2]
    S = k_ref.shape[2]

    q = (q_ref[0, 0].astype(jnp.float32) * scale).astype(mm_dtype)   # (L, E)
    k = k_ref[0, 0].astype(mm_dtype)                                 # (S, E)
    v = v_ref[0, 0].astype(mm_dtype)                                 # (S, D)

    # q @ k.T: contraction on the E axis of BOTH operands -> MXU-native
    # transposed-RHS matmul, no XLU transpose of K.
    s = lax.dot_general(q, k, (((1,), (1,)), ((), ())),
                        preferred_element_type=jnp.float32)          # (L, S)

    if has_bias:
        s = s + bias_ref[...].astype(jnp.float32)
    if is_causal:
        row = lax.broadcasted_iota(jnp.int32, (L, S), 0)
        col = lax.broadcasted_iota(jnp.int32, (L, S), 1)
        s = jnp.where(col <= row, s, -jnp.inf)

    # Numerically-stable softmax in f32; NaN-safe for fully-masked rows
    # (such rows produce zeros, unlike torch which produces NaN).
    m = jnp.max(s, axis=-1, keepdims=True)
    m = jnp.where(m == -jnp.inf, 0.0, m)
    p = jnp.exp(s - m)                                    # unnormalized (L, S)
    l = jnp.sum(p, axis=-1, keepdims=True)
    l_safe = jnp.where(l > 0.0, l, 1.0)

    if output_attention:
        # Exact normalization for the returned weights (rows sum to 1);
        # reuse the normalized weights for the PV matmul.
        a = p * (1.0 / l_safe)
        a_ref[0, 0] = a.astype(a_ref.dtype)
        o = jnp.dot(a.astype(mm_dtype), v, preferred_element_type=jnp.float32)
        o_ref[0, 0] = o.astype(o_ref.dtype)
    else:
        # Deferred normalization: scale the (L, D) output instead of the
        # (L, S) weights; divide goes to the EUP via approx reciprocal.
        o = jnp.dot(p.astype(mm_dtype), v, preferred_element_type=jnp.float32)
        o_ref[0, 0] = (o * pl.reciprocal(l_safe, approx=True)).astype(o_ref.dtype)


def _flash_attention_kernel(*refs, scale, is_causal, has_bias, mm_dtype,
                            block_q, block_k):
    """grid=(B, H, L//tq, S//tk): online-softmax over S tiles."""
    q_ref, k_ref, v_ref = refs[:3]
    idx = 3
    bias_ref = None
    if has_bias:
        bias_ref = refs[idx]
        idx += 1
    o_ref = refs[idx]
    m_sc, l_sc, acc_sc = refs[idx + 1: idx + 4]

    qi = pl.program_id(2)
    ki = pl.program_id(3)

    @pl.when(ki == 0)
    def _init():
        m_sc[...] = jnp.full(m_sc.shape, -jnp.inf, dtype=m_sc.dtype)
        l_sc[...] = jnp.zeros(l_sc.shape, dtype=l_sc.dtype)
        acc_sc[...] = jnp.zeros(acc_sc.shape, dtype=acc_sc.dtype)

    def _compute():
        q = (q_ref[0, 0].astype(jnp.float32) * scale).astype(mm_dtype)  # (tq, E)
        k = k_ref[0, 0].astype(mm_dtype)                                # (tk, E)
        v = v_ref[0, 0].astype(mm_dtype)                                # (tk, D)
        s = lax.dot_general(q, k, (((1,), (1,)), ((), ())),
                            preferred_element_type=jnp.float32)         # (tq, tk)
        if has_bias:
            s = s + bias_ref[...].astype(jnp.float32)
        if is_causal:
            row = qi * block_q + lax.broadcasted_iota(
                jnp.int32, (block_q, block_k), 0)
            col = ki * block_k + lax.broadcasted_iota(
                jnp.int32, (block_q, block_k), 1)
            s = jnp.where(col <= row, s, -jnp.inf)

        m_prev = m_sc[...]
        m_new = jnp.maximum(m_prev, jnp.max(s, axis=-1, keepdims=True))
        m_safe = jnp.where(m_new == -jnp.inf, 0.0, m_new)   # NaN-safe
        alpha = jnp.exp(m_prev - m_safe)
        p = jnp.exp(s - m_safe)
        l_sc[...] = alpha * l_sc[...] + jnp.sum(p, axis=-1, keepdims=True)
        pv = jnp.dot(p.astype(mm_dtype), v, preferred_element_type=jnp.float32)
        acc_sc[...] = alpha * acc_sc[...] + pv
        m_sc[...] = m_new

    if is_causal:
        # Skip KV tiles entirely above the diagonal (~2x for causal).
        @pl.when(ki * block_k <= qi * block_q + (block_q - 1))
        def _():
            _compute()
    else:
        _compute()

    @pl.when(ki == pl.num_programs(3) - 1)
    def _finalize():
        l = l_sc[...]
        l_safe = jnp.where(l > 0.0, l, 1.0)
        o_ref[0, 0] = (acc_sc[...] *
                       pl.reciprocal(l_safe, approx=True)).astype(o_ref.dtype)


# ---------------------------------------------------------------------------
# Helpers
# ---------------------------------------------------------------------------

def _pick_tile(n, preferred):
    if n <= preferred:
        return n
    candidates = [preferred] + [c for c in (512, 256, 128, 64, 32, 16, 8)
                                if c < preferred]
    for t in candidates:
        if n % t == 0:
            return t
    return n


def _tpu_vmem_bytes():
    try:
        info = pltpu.get_tpu_info()
        vmem = getattr(info, "vmem_capacity_bytes", None)
        if vmem:
            return int(vmem)
    except Exception:
        pass
    return 64 * 1024 * 1024      # conservative default (v7x per-core VMEM)


def _vmem_limit(needed_bytes, physical_bytes):
    # Cap below physical VMEM (v7x: ~51 MiB of 64; v5e/v6e: ~102 MiB of 128).
    cap = int(physical_bytes * 0.8)
    if needed_bytes <= 8 * 1024 * 1024:     # under every chip's default scoped limit
        return None
    return int(min(cap, max(needed_bytes * 3 // 2, 32 * 1024 * 1024)))


# ---------------------------------------------------------------------------
# Public wrapper
# ---------------------------------------------------------------------------

def full_attention(queries, keys, values, attn_mask=None, *, is_causal=False,
                   output_attention=False, bf16_matmul=False, attn_impl=None,
                   block_q=None, block_k=None):
    """JAX/Pallas equivalent of FullAttention.forward (eval mode, attn_drop=0).

    Boolean attn_mask: True = attend, False = masked (matches the module's
    masked_fill_(attn_mask.logical_not(), -inf)). Float masks are added.
    """
    B, H, L, E = queries.shape
    _, _, S, D = values.shape
    assert keys.shape == (B, H, S, E)
    scale = float(E) ** (-0.5)
    if is_causal:
        assert attn_mask is None, "is_causal requires attn_mask=None"
    has_bias = attn_mask is not None

    in_dtype = queries.dtype
    mm_dtype = jnp.bfloat16 if bf16_matmul else in_dtype
    itemsize = jnp.dtype(in_dtype).itemsize

    attn_bias = None
    if has_bias:
        if attn_mask.dtype == jnp.bool_:
            attn_bias = jnp.where(attn_mask, jnp.float32(0.0),
                                  jnp.float32(-jnp.inf))
        else:
            attn_bias = attn_mask.astype(jnp.float32)
        attn_bias = jnp.broadcast_to(attn_bias, (L, S)).astype(in_dtype)

    physical_vmem = _tpu_vmem_bytes()

    # Per-step VMEM estimate for the resident kernel, including the f32
    # in-kernel temporaries (scores / exp, output, row stats, iota masks).
    resident_needed = (
        2 * itemsize * (L * E + S * E + S * D + L * D
                        + (L * S if has_bias else 0)
                        + (L * S if output_attention else 0))
        + 4 * (2 * L * S + L * D + 4 * L)
        + (4 * 2 * L * S if is_causal else 0)
        + (4 * L * S if output_attention else 0))

    if attn_impl is None:
        use_flash = (not output_attention) and resident_needed > 12 * 1024 * 1024
    else:
        # TODO(synk): flash variant cannot return attention weights; fall back.
        use_flash = (attn_impl == "flash") and not output_attention

    # ---------------- flash (online-softmax) path ----------------
    if use_flash:
        pref_q = block_q or 256
        pref_k = block_k or (256 if physical_vmem <= 64 * 1024 * 1024 else 512)
        tq = _pick_tile(L, pref_q)
        tk = _pick_tile(S, pref_k)

        flash_needed = (
            2 * itemsize * (tq * E + tk * E + tk * D + tq * D
                            + (tq * tk if has_bias else 0))
            + 4 * (2 * tq * tk + 2 * tq * D + 6 * tq)
            + (4 * 2 * tq * tk if is_causal else 0)
            + 4 * (tq * D + 2 * tq))                     # scratch acc/m/l

        inputs = [queries, keys, values]
        in_specs = [
            pl.BlockSpec((1, 1, tq, E), lambda b, h, qi, ki: (b, h, qi, 0)),
            pl.BlockSpec((1, 1, tk, E), lambda b, h, qi, ki: (b, h, ki, 0)),
            pl.BlockSpec((1, 1, tk, D), lambda b, h, qi, ki: (b, h, ki, 0)),
        ]
        if has_bias:
            inputs.append(attn_bias)
            in_specs.append(pl.BlockSpec((tq, tk),
                                         lambda b, h, qi, ki: (qi, ki)))

        kernel = functools.partial(
            _flash_attention_kernel, scale=scale, is_causal=is_causal,
            has_bias=has_bias, mm_dtype=mm_dtype, block_q=tq, block_k=tk)

        out = pl.pallas_call(
            kernel,
            out_shape=jax.ShapeDtypeStruct((B, H, L, D), in_dtype),
            grid_spec=pltpu.PrefetchScalarGridSpec(
                num_scalar_prefetch=0,
                grid=(B, H, L // tq, S // tk),
                in_specs=in_specs,
                out_specs=pl.BlockSpec((1, 1, tq, D),
                                       lambda b, h, qi, ki: (b, h, qi, 0)),
                scratch_shapes=[pltpu.VMEM((tq, 1), jnp.float32),
                                pltpu.VMEM((tq, 1), jnp.float32),
                                pltpu.VMEM((tq, D), jnp.float32)]),
            compiler_params=pltpu.CompilerParams(
                dimension_semantics=("parallel", "parallel", "parallel",
                                     "arbitrary"),
                vmem_limit_bytes=_vmem_limit(flash_needed, physical_vmem)),
        )(*inputs)
        return out, None

    # ---------------- resident (per-head full softmax) path ----------------
    inputs = [queries, keys, values]
    in_specs = [
        pl.BlockSpec((1, 1, L, E), lambda b, h: (b, h, 0, 0)),
        pl.BlockSpec((1, 1, S, E), lambda b, h: (b, h, 0, 0)),
        pl.BlockSpec((1, 1, S, D), lambda b, h: (b, h, 0, 0)),
    ]
    if has_bias:
        inputs.append(attn_bias)
        in_specs.append(pl.BlockSpec((L, S), lambda b, h: (0, 0)))

    out_shapes = [jax.ShapeDtypeStruct((B, H, L, D), in_dtype)]
    out_specs = [pl.BlockSpec((1, 1, L, D), lambda b, h: (b, h, 0, 0))]
    if output_attention:
        out_shapes.append(jax.ShapeDtypeStruct((B, H, L, S), in_dtype))
        out_specs.append(pl.BlockSpec((1, 1, L, S), lambda b, h: (b, h, 0, 0)))

    kernel = functools.partial(
        _resident_attention_kernel, scale=scale, is_causal=is_causal,
        has_bias=has_bias, output_attention=output_attention,
        mm_dtype=mm_dtype)

    results = pl.pallas_call(
        kernel,
        out_shape=tuple(out_shapes),
        grid_spec=pltpu.PrefetchScalarGridSpec(
            num_scalar_prefetch=0,
            grid=(B, H),
            in_specs=in_specs,
            out_specs=out_specs),
        compiler_params=pltpu.CompilerParams(
            dimension_semantics=("parallel", "parallel"),
            vmem_limit_bytes=_vmem_limit(resident_needed, physical_vmem)),
    )(*inputs)

    out = results[0]                      # (B, H, L, D) -- no wrapper transpose
    attn = results[1] if output_attention else None
    return out, attn


# ---------------------------------------------------------------------------
# Self-test
# ---------------------------------------------------------------------------

if __name__ == "__main__":
    def reference(q, k, v, bias, scale):
        s = (q * scale) @ jnp.swapaxes(k, -2, -1)
        if bias is not None:
            s = s + bias
        p = jax.nn.softmax(s, axis=-1)
        return p @ v, p

    key = jax.random.PRNGKey(0)

    # Small config consistent with the module: d_model=32, n_heads=4 -> head_dim=8
    B, H, L, S, E = 2, 4, 8, 8, 8
    D = E
    scale = float(E) ** (-0.5)
    kq, kk, kv = jax.random.split(key, 3)
    queries = jax.random.normal(kq, (B, H, L, E), dtype=jnp.float32)
    keys = jax.random.normal(kk, (B, H, S, E), dtype=jnp.float32)
    values = jax.random.normal(kv, (B, H, S, D), dtype=jnp.float32)

    # 1) plain attention, also returning the attention weights (exact softmax)
    out, attn = full_attention(queries, keys, values, attn_mask=None,
                               is_causal=False, output_attention=True)
    out = jax.block_until_ready(out)
    attn = jax.block_until_ready(attn)
    ref_out, ref_attn = reference(queries, keys, values, None, scale)
    assert out.shape == (B, H, L, D) and attn.shape == (B, H, L, S)
    assert jnp.allclose(out, ref_out, atol=5e-3, rtol=5e-3)
    assert jnp.allclose(attn, ref_attn, atol=5e-3, rtol=5e-3)

    # 2) causal attention, no attention-weights output (in-kernel iota mask)
    out_c, attn_c = full_attention(queries, keys, values, attn_mask=None,
                                   is_causal=True, output_attention=False)
    out_c = jax.block_until_ready(out_c)
    causal_bias = jnp.where(jnp.tril(jnp.ones((L, S), bool)), 0.0, -jnp.inf)
    ref_c, _ = reference(queries, keys, values, causal_bias, scale)
    assert attn_c is None
    assert jnp.allclose(out_c, ref_c, atol=5e-3, rtol=5e-3)

    # 3) explicit boolean mask (True = attend) exercising the bias path
    out_m, _ = full_attention(queries, keys, values,
                              attn_mask=jnp.tril(jnp.ones((L, S), bool)),
                              is_causal=False, output_attention=False)
    out_m = jax.block_until_ready(out_m)
    assert jnp.allclose(out_m, ref_c, atol=5e-3, rtol=5e-3)

    # 4) bf16 MXU fast path on the resident kernel (looser tolerance)
    out_b, _ = full_attention(queries, keys, values, attn_mask=None,
                              is_causal=False, output_attention=False,
                              bf16_matmul=True)
    out_b = jax.block_until_ready(out_b)
    assert jnp.allclose(out_b, ref_out, atol=3e-2, rtol=3e-2)

    # 5) flash (online-softmax) path, forced at a modest tileable shape
    Bf, Hf, Lf, Sf, Ef = 1, 2, 256, 256, 16
    scale_f = float(Ef) ** (-0.5)
    kq2, kk2, kv2 = jax.random.split(jax.random.PRNGKey(1), 3)
    qf = jax.random.normal(kq2, (Bf, Hf, Lf, Ef), dtype=jnp.float32)
    kf = jax.random.normal(kk2, (Bf, Hf, Sf, Ef), dtype=jnp.float32)
    vf = jax.random.normal(kv2, (Bf, Hf, Sf, Ef), dtype=jnp.float32)
    out_f, attn_f = full_attention(qf, kf, vf, attn_mask=None,
                                   is_causal=True, output_attention=False,
                                   attn_impl="flash", block_q=128, block_k=128)
    out_f = jax.block_until_ready(out_f)
    causal_bias_f = jnp.where(jnp.tril(jnp.ones((Lf, Sf), bool)), 0.0, -jnp.inf)
    ref_f, _ = reference(qf, kf, vf, causal_bias_f, scale_f)
    assert attn_f is None
    assert jnp.allclose(out_f, ref_f, atol=5e-3, rtol=5e-3)

    print("KERNEL_OK")
</pallas_src>

<mosaic_0001>
module attributes {stable_mosaic.version = 11 : i64} {
  func.func @_resident_attention_kernel(%arg0: i32, %arg1: i32, %arg2: memref<1x1x8x8xf32, #tpu.memory_space<vmem>>, %arg3: memref<1x1x8x8xf32, #tpu.memory_space<vmem>>, %arg4: memref<1x1x8x8xf32, #tpu.memory_space<vmem>>, %arg5: memref<1x1x8x8xf32, #tpu.memory_space<vmem>>, %arg6: memref<1x1x8x8xf32, #tpu.memory_space<vmem>>) attributes {dimension_semantics = [#tpu.dimension_semantics<parallel>, #tpu.dimension_semantics<parallel>], iteration_bounds = array<i64: 2, 4>, scalar_prefetch = 0 : i64, scratch_operands = 0 : i64, tpu.core_type = #tpu.core_type<tc>, window_params = [{transform_indices = @transform_0, window_bounds = array<i64: 1, 1, 8, 8>}, {transform_indices = @transform_1, window_bounds = array<i64: 1, 1, 8, 8>}, {transform_indices = @transform_2, window_bounds = array<i64: 1, 1, 8, 8>}, {transform_indices = @transform_3, window_bounds = array<i64: 1, 1, 8, 8>}, {transform_indices = @transform_4, window_bounds = array<i64: 1, 1, 8, 8>}]} {
    %c0 = arith.constant 0 : index
    %c0_0 = arith.constant 0 : index
    %c0_1 = arith.constant 0 : index
    %c0_2 = arith.constant 0 : index
    %0 = vector.load %arg2[%c0, %c0_0, %c0_1, %c0_2] : memref<1x1x8x8xf32, #tpu.memory_space<vmem>>, vector<1x1x8x8xf32>
    %1 = vector.shape_cast %0 : vector<1x1x8x8xf32> to vector<8x8xf32>
    %cst = arith.constant 0.353553385 : f32
    %2 = vector.broadcast %cst : f32 to vector<8x8xf32>
    %3 = arith.mulf %1, %2 : vector<8x8xf32>
    %c0_3 = arith.constant 0 : index
    %c0_4 = arith.constant 0 : index
    %c0_5 = arith.constant 0 : index
    %c0_6 = arith.constant 0 : index
    %4 = vector.load %arg3[%c0_3, %c0_4, %c0_5, %c0_6] : memref<1x1x8x8xf32, #tpu.memory_space<vmem>>, vector<1x1x8x8xf32>
    %5 = vector.shape_cast %4 : vector<1x1x8x8xf32> to vector<8x8xf32>
    %c0_7 = arith.constant 0 : index
    %c0_8 = arith.constant 0 : index
    %c0_9 = arith.constant 0 : index
    %c0_10 = arith.constant 0 : index
    %6 = vector.load %arg4[%c0_7, %c0_8, %c0_9, %c0_10] : memref<1x1x8x8xf32, #tpu.memory_space<vmem>>, vector<1x1x8x8xf32>
    %7 = vector.shape_cast %6 : vector<1x1x8x8xf32> to vector<8x8xf32>
    %cst_11 = arith.constant dense<0.000000e+00> : vector<8x8xf32>
    %8 = tpu.matmul %3, %5, %cst_11 {dimension_numbers = #tpu.dot_dimension_numbers<[1], [1], [0], [0], [0, 0, 1, 0], [], []>} : vector<8x8xf32>, vector<8x8xf32>, vector<8x8xf32> -> vector<8x8xf32>
    %cst_12 = arith.constant dense<0xFF800000> : vector<8xf32>
    %9 = vector.multi_reduction <maximumf>, %8, %cst_12 [1] : vector<8x8xf32> to vector<8xf32>
    %10 = vector.shape_cast %9 : vector<8xf32> to vector<8x1xf32>
    %cst_13 = arith.constant 0xFF800000 : f32
    %11 = vector.broadcast %cst_13 : f32 to vector<8x1xf32>
    %12 = arith.cmpf oeq, %10, %11 : vector<8x1xf32>
    %cst_14 = arith.constant 0.000000e+00 : f32
    %13 = vector.broadcast %cst_14 : f32 to vector<8x1xf32>
    %14 = arith.select %12, %13, %10 : vector<8x1xi1>, vector<8x1xf32>
    %15 = vector.broadcast %14 : vector<8x1xf32> to vector<8x8xf32>
    %16 = arith.subf %8, %15 : vector<8x8xf32>
    %17 = math.exp %16 : vector<8x8xf32>
    %cst_15 = arith.constant dense<0.000000e+00> : vector<8xf32>
    %18 = vector.multi_reduction <add>, %17, %cst_15 [1] : vector<8x8xf32> to vector<8xf32>
    %19 = vector.shape_cast %18 : vector<8xf32> to vector<8x1xf32>
    %cst_16 = arith.constant 0.000000e+00 : f32
    %20 = vector.broadcast %cst_16 : f32 to vector<8x1xf32>
    %21 = arith.cmpf ogt, %19, %20 : vector<8x1xf32>
    %cst_17 = arith.constant 1.000000e+00 : f32
    %22 = vector.broadcast %cst_17 : f32 to vector<8x1xf32>
    %23 = arith.select %21, %19, %22 : vector<8x1xi1>, vector<8x1xf32>
    %cst_18 = arith.constant 1.000000e+00 : f32
    %24 = vector.broadcast %cst_18 : f32 to vector<8x1xf32>
    %25 = arith.divf %24, %23 : vector<8x1xf32>
    %26 = vector.broadcast %25 : vector<8x1xf32> to vector<8x8xf32>
    %27 = arith.mulf %17, %26 : vector<8x8xf32>
    %c0_19 = arith.constant 0 : index
    %c0_20 = arith.constant 0 : index
    %c0_21 = arith.constant 0 : index
    %c0_22 = arith.constant 0 : index
    %28 = vector.load %arg6[%c0_19, %c0_20, %c0_21, %c0_22] : memref<1x1x8x8xf32, #tpu.memory_space<vmem>>, vector<1x1x8x8xf32>
    %29 = vector.shape_cast %28 : vector<1x1x8x8xf32> to vector<8x8xf32>
    %30 = vector.shape_cast %27 : vector<8x8xf32> to vector<1x1x8x8xf32>
    tpu.vector_store %arg6[%c0_19, %c0_20, %c0_21, %c0_22], %30 {strides = array<i32>} : memref<1x1x8x8xf32, #tpu.memory_space<vmem>>, vector<1x1x8x8xf32>,
    %cst_23 = arith.constant dense<0.000000e+00> : vector<8x8xf32>
    %31 = tpu.matmul %27, %7, %cst_23 {dimension_numbers = #tpu.dot_dimension_numbers<[1], [0], [0], [1], [0, 0, 1, 1], [], []>} : vector<8x8xf32>, vector<8x8xf32>, vector<8x8xf32> -> vector<8x8xf32>
    %c0_24 = arith.constant 0 : index
    %c0_25 = arith.constant 0 : index
    %c0_26 = arith.constant 0 : index
    %c0_27 = arith.constant 0 : index
    %32 = vector.load %arg5[%c0_24, %c0_25, %c0_26, %c0_27] : memref<1x1x8x8xf32, #tpu.memory_space<vmem>>, vector<1x1x8x8xf32>
    %33 = vector.shape_cast %32 : vector<1x1x8x8xf32> to vector<8x8xf32>
    %34 = vector.shape_cast %31 : vector<8x8xf32> to vector<1x1x8x8xf32>
    tpu.vector_store %arg5[%c0_24, %c0_25, %c0_26, %c0_27], %34 {strides = array<i32>} : memref<1x1x8x8xf32, #tpu.memory_space<vmem>>, vector<1x1x8x8xf32>,
    return
  }
  func.func @transform_0(%arg0: i32, %arg1: i32) -> (i32, i32, i32, i32) {
    %c0_i32 = arith.constant 0 : i32
    %c0_i32_0 = arith.constant 0 : i32
    %c0_i32_1 = arith.constant 0 : i32
    return %arg0, %arg1, %c0_i32, %c0_i32_0 : i32, i32, i32, i32
  }
  func.func @transform_1(%arg0: i32, %arg1: i32) -> (i32, i32, i32, i32) {
    %c0_i32 = arith.constant 0 : i32
    %c0_i32_0 = arith.constant 0 : i32
    %c0_i32_1 = arith.constant 0 : i32
    return %arg0, %arg1, %c0_i32, %c0_i32_0 : i32, i32, i32, i32
  }
  func.func @transform_2(%arg0: i32, %arg1: i32) -> (i32, i32, i32, i32) {
    %c0_i32 = arith.constant 0 : i32
    %c0_i32_0 = arith.constant 0 : i32
    %c0_i32_1 = arith.constant 0 : i32
    return %arg0, %arg1, %c0_i32, %c0_i32_0 : i32, i32, i32, i32
  }
  func.func @transform_3(%arg0: i32, %arg1: i32) -> (i32, i32, i32, i32) {
    %c0_i32 = arith.constant 0 : i32
    %c0_i32_0 = arith.constant 0 : i32
    %c0_i32_1 = arith.constant 0 : i32
    return %arg0, %arg1, %c0_i32, %c0_i32_0 : i32, i32, i32, i32
  }
  func.func @transform_4(%arg0: i32, %arg1: i32) -> (i32, i32, i32, i32) {
    %c0_i32 = arith.constant 0 : i32
    %c0_i32_0 = arith.constant 0 : i32
    %c0_i32_1 = arith.constant 0 : i32
    return %arg0, %arg1, %c0_i32, %c0_i32_0 : i32, i32, i32, i32
  }
}

</mosaic_0001>

<bundles_post_ra>
// kernel: tpu_custom_call.1
= control target key start
LH: loop header
LB: loop body
LE: loop exit
PB: predicated region body
PF: predicated region fallthrough
CT: control target
= control target key end

     0   :  { %s1203_s0 = inlined_call_operand.hbm [shape: f32[2,4,8,8], index: 0, kind: input, shape index: {}]   ;;  %s1204_s1 = inlined_call_operand.hbm [shape: f32[2,4,8,8], index: 1, kind: input, shape index: {}]   ;;  %s1205_s2 = inlined_call_operand.hbm [shape: f32[2,4,8,8], index: 2, kind: input, shape index: {}]   ;;  %s1206_s3 = inlined_call_operand.hbm [shape: f32[2,4,8,8], index: 3, kind: output, shape index: {0}]   ;;  %s1207_s4 = inlined_call_operand.hbm [shape: f32[2,4,8,8], index: 4, kind: output, shape index: {1}]  }
   0x1   :  { %1214 = sst [smem:[#allocation22_spill]] %s1204_s1 }
   0x2   :  { %10 = vsyncpa [#allocation3], 0 }
   0x3   :  { %12 = vsyncpa [#allocation3 + $0x1], 0 }
   0x4   :  { %13 = vsyncpa [#allocation6], 0 }
   0x5   :  { %15 = vsyncpa [#allocation6 + $0x1], 0 }
   0x6   :  { %16 = vsyncpa [#allocation4], 0 }
   0x7   :  { %18 = vsyncpa [#allocation4 + $0x1], 0 }
   0x8   :  { %19 = vsyncpa [#allocation10], 0 }
   0x9   :  { %21 = vsyncpa [#allocation10 + $0x1], 0  ;;  %s998_s15 = smov 0   ;;  %s1000_s16 = smov 0  }
   0xa   :  { %s1002_s17 = smov 0   ;;  %s1004_s18 = smov 0  }
   0xb   :  { %s1006_s19 = smov 0   ;;  %s1008_s20 = smov 0  }
   0xc   :  { %s1010_s21 = smov 0   ;;  %s1012_s22 = smov 0  }
   0xd LB: > { %1215 = sst [smem:[#allocation15_spill]] %s951_s17  ;;  %s1039_s23 = sadd.s32 4294967295, %s971_s22   ;;  %s971_s22 = sphi %s1012_s22, %s27_s22   ;;  %s967_s21 = sphi %s1010_s21, %s1235_s21   ;;  %s963_s20 = sphi %s1008_s20, %s1234_s20   ;;  %s959_s19 = sphi %s1006_s19, %s1233_s19   ;;  %s955_s18 = sphi %s1004_s18, %s1232_s18   ;;  %s951_s17 = sphi %s1002_s17, %s1231_s17   ;;  %s947_s16 = sphi %s1000_s16, %s1237_s16   ;;  %s943_s15 = sphi %s998_s15, %s1236_s15  }
   0xe   : > { %1216 = sst [smem:[#allocation16_spill]] %s963_s20  ;;  %s621_s24 = sadd.s32 4294967294, %s971_s22  }
   0xf   : > { %1217 = sst [smem:[#allocation17_spill]] %s967_s21  ;;  %s36_s25 = sadd.s32 1, %s963_s20 }
  0x10   : > { %s39_s26 = sadd.s32 1, %s967_s21  ;;  %p37_p0 = scmp.ge.s32.totalorder %s36_s25, 4 }
  0x11   : > { %s48_s27 = sadd.s32 1, %s951_s17  ;;  %p55_p1 = scmp.ne.s32.totalorder %s951_s17, %s947_s16 }
  0x12   : > { %p56_p2 = scmp.eq.s32.totalorder %s971_s22, 0  ;;  %s1239_s25 = smov (%p37_p0, %s36_s25), 0 }
  0x13   : > { %1218 = sst [smem:[#allocation18_spill]] %s1239_s25  ;;  %s1241_s26 = smov (!%p37_p0, %s39_s26), %s967_s21 }
  0x14   : > { %s44_s28 = ssub.s32 %s963_s20, %s1239_s25  ;;  %p1053_p3 = por %p56_p2, %p55_p1 }
  0x15   : > { %p41_p4 = scmp.ge.s32.totalorder %s1241_s26, 2  ;;  %p61_p5 = scmp.ne.s32.totalorder %s947_s16, %s943_s15 }
  0x16   : > { %p62_p6 = scmp.eq.s32.totalorder %s1039_s23, 0  ;;  %p143_p7 = scmp.eq.s32.totalorder %s1039_s23, 7 }
  0x17   : > { %s1243_s26 = smov (%p41_p4, %s1241_s26), 0  ;;  %p149_p10 = scmp.eq.s32.totalorder %s621_s24, 7 }
  0x18   : > { %1220 = sst [smem:[#allocation19_spill]] %s1243_s26  ;;  %p1063_p8 = por %p62_p6, %p61_p5 }
  0x19   : > { %p1067_p9 = por %p143_p7, %p55_p1  ;;  %s43_s6 = ssub.s32 %s967_s21, %s1243_s26 }
  0x1a   : > { %s45_s7 = sor.u32 %s44_s28, %s43_s6  ;;  %p1073_p12 = por %p149_p10, %p61_p5 }
  0x1b   : > { %p46_p11 = scmp.eq.s32.totalorder %s45_s7, 0  ;;  %p677_p13 = scmp.lt.s32.totalorder %s971_s22, 8 }
  0x1c   : > { %s1223_s8 = scalar_select %p1073_p12, 1, 0 }
  0x1d   : > { %s197_s9 = sand.u32 1, %s951_s17   ;;  %s625_s12 = sshll.u32 %s967_s21, 2 }
  0x1e   : > { %1224 = sst [smem:[#allocation20_spill]] %s1223_s8  ;;  %s624_s11 = sshll.u32 %s197_s9, 3 }
  0x1f   : > { %s1080_s10 = scalar_select %p46_p11, %s951_s17, %s48_s27  }
  0x20   : > { %s205_s13 = sadd.s32 %s963_s20, %s625_s12  ;;  %p1086_p0 = pnand %p677_p13, %p1053_p3 }
  0x21   : > { %1225 = sst [smem:[#allocation21_spill]] %s1080_s10  ;;  %s626_s24 = sshll.u32 %s205_s13, 3 }
  0x22   : > { %s218_s28 = sand.u32 1, %s971_s22   ;;  %s1227_s1 = sld [smem:[#allocation22_spill]] }
  0x23   : > { %s222_s8 = scalar_lea.vmem [#allocation5], %s624_s11  ;;  %s219_s21 = scalar_lea.sflag [#allocation6], %s218_s28 }
  0x24   : > { %s232_s27 = sshll.u32 %s222_s8, 4  ;;  %p633_p1 = scmp.ge.s32.totalorder %s971_s22, 1  ;;  %s233_s27 = int_to_ptr.vmem [resolvable:$true] %s232_s27 }
  0x25   : > { %p258_p2 = scmp.lt.s32.totalorder %s971_s22, 9  ;;  %s207_s6 = scalar_lea.hbm %s1203_s0, %s626_s24 }
  0x26   : > { %s201_s7 = scalar_lea.vmem [#allocation2], %s624_s11  ;;  %s198_s8 = scalar_lea.sflag [#allocation3], %s197_s9 }
  0x27   : > { %p1098_p3 = pnand %p633_p1, %p258_p2  ;;  %s243_s10 = scalar_lea.vmem [#allocation7], %s624_s11 }
  0x28   : > { %s228_s26 = scalar_lea.hbm %s1227_s1, %s626_s24  ;;  %s211_s1 = sshll.u32 %s201_s7, 4  ;;  %s212_s1 = int_to_ptr.vmem [resolvable:$true] %s211_s1 }
  0x29   : > { %s230_s25 = sshll.u32 %s228_s26, 4  ;;  %s209_s26 = sshll.u32 %s207_s6, 4  ;;  %s231_s25 = int_to_ptr.hbm [resolvable:$true] %s230_s25  ;;  %s210_s26 = int_to_ptr.hbm [resolvable:$true] %s209_s26 }
  0x2a   : > { %666 = dma.hbm_to_vmem [thread:$0]  (!%p1086_p0), %s231_s25, 128, %s233_s27, %s219_s21  }
  0x2b   : > { %663 = dma.hbm_to_vmem [thread:$0]  (!%p1086_p0), %s210_s26, 128, %s212_s1, %s198_s8  }
  0x2c   : > { %s249_s27 = scalar_lea.hbm %s1205_s2, %s626_s24  ;;  %s253_s17 = sshll.u32 %s243_s10, 4  ;;  %s254_s17 = int_to_ptr.vmem [resolvable:$true] %s253_s17 }
  0x2d   : > { %s251_s20 = sshll.u32 %s249_s27, 4  ;;  %262 = sbr.rel (%p1098_p3) target bundleno = 581 (0x245), region = 32  ;;  %s252_s20 = int_to_ptr.hbm [resolvable:$true] %s251_s20 }
  0x2e   : > { %669 = dma.hbm_to_vmem [thread:$0]  (!%p1086_p0), %s252_s20, 128, %s254_s17, %s219_s21  }
  0x2f   : > { %s1115_s12 = sand.u32 (!%p1098_p3), 1, %s947_s16  }
  0x30   : > { %s1118_s1 = sshll.u32 (!%p1098_p3), %s1115_s12, 3  ;;  %s265_s9 = scalar_lea.sflag (!%p1098_p3), [#allocation3], %s1115_s12 }
  0x31   : > { %s268_s24 = scalar_lea.vmem (!%p1098_p3), [#allocation2], %s1118_s1 }
  0x32   : > { %926 = dma.done.wait (%p1063_p8), %s265_s9, 128  }
  0x33   : > { %928 = vsyncadd (%p1063_p8), %s265_s9, 4294967168  ;;  %s274_s17 = sand.u32 1, %s1039_s23   ;;  %s278_s21 = scalar_lea.vmem [#allocation5], %s1118_s1 }
  0x34   : > { %s275_s20 = scalar_lea.sflag [#allocation6], %s274_s17 }
  0x35   : > { %930 = dma.done.wait (%p1063_p8), %s275_s20, 256  }
  0x36   : > { %932 = vsyncadd (%p1063_p8), %s275_s20, 4294967040  ;;  %vm333_vm0 = vcmask 64512   ;;  %v331_v0 = vld [vmem:[%s278_s21] sm:$0xff]  ;;  %v329_v1 = vld [vmem:[%s268_s24] sm:$0xff]  ;;  %s288_s23 = scalar_lea.vmem [#allocation7], %s1118_s1  ;;  %s644_s30 = sshll.u32 %s959_s19, 2 }
  0x37   : > { %639 = vmatpush.xpose.msk.msra.mxu0 %vm333_vm0, %v331_v0  ;;  %v330_v2 = vmul.f32 0.35355338, %v329_v1  ;;  %v332_v11 = vld [vmem:[%s288_s23] sm:$0xff]  ;;  %s1139_s10 = sadd.s32 %s955_s18, %s644_s30  ;;  %s328_s19 = scalar_lea.vmem [#allocation9], %s1118_s1 }
  0x38   : > { %408 = vmatpush.msra.mxu1 %v332_v11  ;;  %s645_s11 = sshll.u32 %s1139_s10, 3  ;;  %s450_s18 = sshll.u32 %s328_s19, 4  ;;  %s451_s18 = int_to_ptr.vmem [resolvable:$true] %s450_s18 }
  0x39   : > { %s448_s13 = scalar_lea.hbm %s1207_s4, %s645_s11  ;;  %s420_s26 = scalar_lea.sflag [#allocation10], %s1115_s12 }
  0x3a   : > { %640 = vmatmul.msk.f32.vlgmr.msra.gmra.mxu0 %vm333_vm0, %v330_v2  ;;  %s452_s6 = sshll.u32 %s448_s13, 4  ;;  %s857_s27 = scalar_lea.hbm %s1207_s4, 64  ;;  %s453_s6 = int_to_ptr.hbm [resolvable:$true] %s452_s6 }
  0x3b   : > { %s851_s7 = sshra.s32 %s453_s6, 4  ;;  %s852_s7 = int_to_ptr.hbm [resolvable:$true] %s851_s7 }
  0x3c   : > { %s853_s8 = scalar_lea.hbm %s852_s7, 8  ;;  %p858_p7 = scmp.lt.s32.totalorder %s852_s7, %s1207_s4 }
  0x3d   : > { %p854_p4 = scmp.ne.s32.totalorder %s852_s7, %s853_s8  ;;  %p859_p8 = scmp.lt.s32.totalorder %s857_s27, %s853_s8 }
  0x3f   : > { %p855_p5 = pnand %p854_p4, %p1067_p9  ;;  %p860_p10 = por %p859_p8, %p858_p7 }
  0x41   : > { %p856_p6 = pneg %p855_p5 }
  0x43   : > { %p861_p11 = pnand %p860_p10, %p856_p6 }
  0xb7   : > { %v357_v3 = vpop.f32.mrf.mxu0 }
  0xb8   : > { %v360_v4 = vsel %vm333_vm0, %v357_v3, -inf }
  0xb9   : > { %361 = vmax.xlane.f32.xlu0 %v360_v4 }
 0x12c   : > { %v362_v5 = vpop.xlane.xlu0 %361 }
 0x12d   : > { %vm363_vm1 = vcmp.eq.f32.partialorder %v362_v5, -inf }
 0x12e   : > { %v364_v6 = vsel %vm363_vm1, 0.0, %v362_v5 }
 0x12f   : > { %v365_v7 = vsub.f32 %v357_v3, %v364_v6 }
 0x131   : > { %v366_v8 = vmul.f32 1.442695, %v365_v7 }
 0x133   : > { %743 = vpow2.f32 %v366_v8 }
 0x139   : > { %v744_v9 = vpop.eup %743 }
 0x13a   : > { %v368_v10 = vsel %vm333_vm0, %v744_v9, 0.0 }
 0x13b   : > { %369 = vadd.xlane.f32.xlu0 %v368_v10 }
 0x1ae   : > { %v370_v12 = vpop.xlane.xlu0 %369 }
 0x1af   : > { %vm371_vm2 = vcmp.gt.f32.partialorder %v370_v12, 0.0 }
 0x1b0   : > { %v372_v13 = vsel %vm371_vm2, %v370_v12, 1.0 }
 0x1b1   : > { %745 = vrcp.f32 %v372_v13  ;;  %v384_v17 = vand.u32 2147483648, %v372_v13  ;;  %v382_v19 = vand.u32 2147483647, %v372_v13  ;;  %vm378_vm4 = vweird.f32 %v372_v13 }
 0x1b3   : > { %v385_v21 = vor.u32 1.1754944e-38, %v384_v17  ;;  %vm383_vm6 = vcmp.eq.f32.partialorder %v382_v19, 8.507059e+37 }
 0x1b7   : > { %v746_v14 = vpop.eup %745 }
 0x1b8   : > { %v374_v15 = vmul.f32 %v746_v14, %v372_v13  ;;  %vm379_vm3 = vweird.f32 %v746_v14 }
 0x1b9   : > { %vm380_vm5 = vmor %vm378_vm4, %vm379_vm3 }
 0x1ba   : > { %v375_v16 = vsub.f32 1.0, %v374_v15 }
 0x1bc   : > { %v376_v18 = vmul.f32 %v746_v14, %v375_v16 }
 0x1be   : > { %v377_v20 = vadd.f32 %v746_v14, %v376_v18 }
 0x1c0   : > { %v381_v22 = vsel %vm380_vm5, %v746_v14, %v377_v20 }
 0x1c1   : > { %v386_v23 = vsel %vm383_vm6, %v385_v21, %v381_v22 }
 0x1c2   : > { %v388_v24 = vmul.f32 %v744_v9, %v386_v23 }
 0x1c4   : > { %641 = vmatmul.msk.f32.vlgmr.msra.gmra.mxu1 %vm333_vm0, %v388_v24  ;;  %389 = vst.msk [vmem:[%s328_s19] sm:$0xff] %vm333_vm0, %v388_v24 }
 0x1c5   : > { %864 = shalt.err (!%p861_p11)
}
 0x1c6   : > { %657 = dma.vmem_to_hbm [thread:$0]  (%p1067_p9), %s451_s18, 128, %s453_s6, %s420_s26  }
 0x1c7   : > { %s432_s21 = scalar_lea.hbm %s1206_s3, %s645_s11  ;;  %s321_s23 = scalar_lea.vmem [#allocation8], %s1118_s1 }
 0x1c8   : > { %s434_s30 = sshll.u32 %s321_s23, 4  ;;  %s436_s10 = sshll.u32 %s432_s21, 4  ;;  %s435_s30 = int_to_ptr.vmem [resolvable:$true] %s434_s30  ;;  %s437_s10 = int_to_ptr.hbm [resolvable:$true] %s436_s10 }
 0x1c9   : > { %s415_s14 = scalar_lea.sflag [#allocation4], %s1115_s12  ;;  %s879_s29 = sshra.s32 %s437_s10, 4  ;;  %s880_s29 = int_to_ptr.hbm [resolvable:$true] %s879_s29 }
 0x1ca   : > { %s881_s13 = scalar_lea.hbm %s880_s29, 8  ;;  %s885_s11 = scalar_lea.hbm %s1206_s3, 64 }
 0x1cb   : > { %p882_p13 = scmp.ne.s32.totalorder %s880_s29, %s881_s13  ;;  %p886_p2 = scmp.lt.s32.totalorder %s880_s29, %s1206_s3 }
 0x1cc   : > { %p887_p3 = scmp.lt.s32.totalorder %s885_s11, %s881_s13 }
 0x1cd   : > { %p883_p0 = pnand %p882_p13, %p1067_p9 }
 0x1ce   : > { %p888_p4 = por %p887_p3, %p886_p2 }
 0x1cf   : > { %p884_p1 = pneg %p883_p0 }
 0x1d1   : > { %p889_p5 = pnand %p888_p4, %p884_p1 }
 0x241   : > { %v410_v25 = vpop.f32.mrf.mxu1 }
 0x242   : > { %413 = vst.msk [vmem:[%s321_s23] sm:$0xff] %vm333_vm0, %v410_v25 }
 0x243   : > { %892 = shalt.err (!%p889_p5)
}
 0x244   : > { %656 = dma.vmem_to_hbm [thread:$0]  (%p1067_p9), %s435_s30, 128, %s437_s10, %s415_s14  }
 0x245 PF: > { %p678_p6 = scmp.ge.s32.totalorder %s971_s22, 2  ;;  %s464_s26 = sand.u32 1, %s943_s15  }
 0x246   : > { %s465_s7 = scalar_lea.sflag [#allocation4], %s464_s26 }
 0x247   : > { %p671_p7 = pnand %p678_p6, %p1073_p12 }
 0x249   : > { %p672_p8 = pneg %p671_p7 }
 0x24b   : > { %934 = dma.done.wait (%p672_p8), %s465_s7, 128  }
 0x24c   : > { %936 = vsyncadd (%p672_p8), %s465_s7, 4294967168  ;;  %s475_s8 = scalar_lea.sflag [#allocation10], %s464_s26 }
 0x24d   : > { %938 = dma.done.wait (%p672_p8), %s475_s8, 128  }
 0x24e   : > { %940 = vsyncadd (%p672_p8), %s475_s8, 4294967168  ;;  %s27_s22 = sadd.s32 1, %s971_s22   ;;  %s1230_s5 = sld [smem:[#allocation15_spill]] }
 0x24f   : > { %p24_p10 = scmp.ge.s32.totalorder %s27_s22, 10   ;;  %s1231_s17 = sld [smem:[#allocation21_spill]] }
 0x250   : > { %s1232_s18 = sld [smem:[#allocation16_spill]]  ;;  %s1236_s15 = smov %s947_s16 }
 0x251   : > { %s1233_s19 = sld [smem:[#allocation17_spill]]  ;;  %26 = sbr.rel (!%p24_p10) target bundleno = 13 (0xd), region = 118 }
 0x252   : > { %s1234_s20 = sld [smem:[#allocation18_spill]] }
 0x253   : > { %s1235_s21 = sld [smem:[#allocation19_spill]] }
 0x254   : > { %s1237_s16 = smov %s1230_s5 }
 0x256   :  { %481 = vsyncpa [#allocation3], 1 }
 0x257   :  { %483 = vsyncpa [#allocation3 + $0x1], 1 }
 0x258   :  { %484 = vsyncpa [#allocation6], 1 }
 0x259   :  { %486 = vsyncpa [#allocation6 + $0x1], 1 }
 0x25a   :  { %487 = vsyncpa [#allocation4], 1 }
 0x25b   :  { %489 = vsyncpa [#allocation4 + $0x1], 1 }
 0x25c   :  { %490 = vsyncpa [#allocation10], 1 }
 0x25d   :  { %492 = vsyncpa [#allocation10 + $0x1], 1 }

</bundles_post_ra>
